<compile_context>
chip_gen: v5e
topology: v5e:2x2
jax: 0.10.0
libtpu: 0.0.40
codegen_flags: <defaults>
</compile_context>

<pallas_src>
import functools

import jax
import jax.numpy as jnp
from jax.experimental import pallas as pl
from jax.experimental.pallas import tpu as pltpu


def _cdiv(a, b):
    return (a + b - 1) // b


def _round_up(n, m):
    return ((n + m - 1) // m) * m


def _vmem_cap_bytes():
    """Generation-aware cap on the scoped-VMEM request (~75% of physical)."""
    phys = 128 * 1024 * 1024  # v5e/v6e default if the query is unavailable
    try:
        phys = int(pltpu.get_tpu_info().vmem_capacity_bytes)
    except Exception:
        pass
    return min(phys * 3 // 4, 100 * 1024 * 1024)


def layer_block_kernel(x_ref, w_ref, b_ref, out_ref, cls_ref, *, p1, n1, n2):
    """One batch tile: fused matmul -> (relu branch, softmax branch)."""
    # In-kernel bf16 cast of x (VPU, hidden under DMA/MXU); f32 accumulation.
    x = x_ref[...].astype(jnp.bfloat16)
    h = jnp.dot(x, w_ref[...], preferred_element_type=jnp.float32)
    h = h + b_ref[...]                       # bias broadcast over batch (f32)

    # ---- output = relu(init_layer(x)): first n1 columns of the fused result
    out_ref[...] = jnp.maximum(h[:, :n1], 0.0).astype(out_ref.dtype)

    # ---- classification_output = softmax(internal_classifier(x), dim=1) ---
    # The real logits start at the lane-aligned offset p1; padded columns of
    # the fused result are never read, so no -1e30 masking is required.
    logits = h[:, p1:p1 + n2]
    m = jnp.max(logits, axis=1, keepdims=True)
    e = jnp.exp(logits - m)
    denom = jnp.sum(e, axis=1, keepdims=True)
    cls_ref[...] = (e * pl.reciprocal(denom, approx=False)).astype(cls_ref.dtype)


def _build_call(*, B, K, tb, nb, n1, n2, p1, nf, out_dtype, vmem_limit, cost,
                single_buffer_params):
    kernel = functools.partial(layer_block_kernel, p1=p1, n1=n1, n2=n2)
    resident_kwargs = (
        dict(pipeline_mode=pl.Buffered(1)) if single_buffer_params else {}
    )
    return pl.pallas_call(
        kernel,
        out_shape=(
            jax.ShapeDtypeStruct((B, n1), out_dtype),   # relu branch, unpadded
            jax.ShapeDtypeStruct((B, n2), out_dtype),   # softmax branch, unpadded
        ),
        grid_spec=pltpu.PrefetchScalarGridSpec(
            num_scalar_prefetch=0,
            grid=(nb,),
            in_specs=[
                pl.BlockSpec((tb, K), lambda i: (i, 0)),                      # x tile (pipelined)
                pl.BlockSpec((K, nf), lambda i: (0, 0), **resident_kwargs),   # fused W (resident)
                pl.BlockSpec((1, nf), lambda i: (0, 0), **resident_kwargs),   # fused b (resident)
            ],
            out_specs=[
                pl.BlockSpec((tb, n1), lambda i: (i, 0)),   # relu branch
                pl.BlockSpec((tb, n2), lambda i: (i, 0)),   # softmax branch
            ],
        ),
        compiler_params=pltpu.CompilerParams(
            dimension_semantics=("parallel",),              # shard batch on v7x
            vmem_limit_bytes=vmem_limit,
        ),
        cost_estimate=cost,
    )


def layer_block(x, w1, b1, w2, b2, *, block_b=1024, out_dtype=jnp.bfloat16):
    """LayerBlock forward.

    x  : (B, in_features)               float32
    w1 : (in_features, out_features)    init_layer weight (pre-transposed)
    b1 : (1, out_features)
    w2 : (in_features, num_classes)     internal_classifier weight (pre-transposed)
    b2 : (1, num_classes)
    returns (output (B, out_features), classification_output (B, num_classes))
    """
    B, K = x.shape
    n1 = w1.shape[1]
    n2 = w2.shape[1]
    p1 = _round_up(n1, 128)          # relu branch start/offset, lane-aligned
    p2 = _round_up(n2, 128)          # softmax branch, lane-aligned width
    nf = p1 + p2                     # fused matmul output width

    # Batch tile: >= 8 rows, <= block_b; prefer >= 2 grid steps so the
    # "parallel" batch axis can shard across v7x's two TensorCores
    # (neutral on v5e/v6e which have a single TC).
    tb = min(block_b, _round_up(B, 8))
    if B > 8:
        tb = min(tb, _round_up(_cdiv(B, 2), 8))
    nb = _cdiv(B, tb)

    # --- fuse + lane-pad parameters (trace-time, tiny) ----------------------
    # Branch 1 occupies columns [0, n1); branch 2 occupies [p1, p1 + n2).
    # Padded columns are zero and are never read by the kernel.
    w = jnp.zeros((K, nf), jnp.float32)
    w = w.at[:, :n1].set(w1).at[:, p1:p1 + n2].set(w2)
    w = w.astype(jnp.bfloat16)                       # bf16 MXU operand

    bias = jnp.zeros((1, nf), jnp.float32)
    bias = bias.at[:, :n1].set(b1).at[:, p1:p1 + n2].set(b2)

    # --- VMEM budget (accurate, no blanket fudge) ---------------------------
    out_bytes = jnp.dtype(out_dtype).itemsize
    vmem_needed = (
        2 * tb * K * 4              # x tile, f32, double-buffered
        + K * nf * 2                # fused weight, bf16, resident
        + nf * 4                    # fused bias, f32, resident
        + 2 * tb * n1 * out_bytes   # relu output tile, double-buffered
        + 2 * tb * n2 * out_bytes   # softmax output tile, double-buffered
        + 4 * tb * nf * 4           # f32 matmul intermediate h + epilogue temps
    )
    vmem_limit = max(32 * 1024 * 1024,
                     min(vmem_needed * 3 // 2, _vmem_cap_bytes()))

    cost = pl.CostEstimate(
        flops=2 * B * K * nf,
        transcendentals=B * n2,
        bytes_accessed=(x.size * 4 + w.size * 2 + bias.size * 4
                        + B * (n1 + n2) * out_bytes),
    )

    call_kwargs = dict(B=B, K=K, tb=tb, nb=nb, n1=n1, n2=n2, p1=p1, nf=nf,
                       out_dtype=out_dtype, vmem_limit=vmem_limit, cost=cost)
    try:
        out, cls = _build_call(single_buffer_params=True, **call_kwargs)(x, w, bias)
        return jax.block_until_ready((out, cls))
    except Exception:
        # Fallback: some Pallas versions reject pl.Buffered(1) on resident
        # blocks; use the default double-buffered pipeline (correct, just a
        # little more VMEM for the never-changing weight/bias blocks).
        out, cls = _build_call(single_buffer_params=False, **call_kwargs)(x, w, bias)
        return jax.block_until_ready((out, cls))


def reference(x, w1, b1, w2, b2):
    """Pure-JAX reference (bf16-rounded operands match what the MXU sees)."""
    xr = x.astype(jnp.bfloat16).astype(jnp.float32)
    w1r = w1.astype(jnp.bfloat16).astype(jnp.float32)
    w2r = w2.astype(jnp.bfloat16).astype(jnp.float32)
    out = jnp.maximum(xr @ w1r + b1, 0.0)
    cls = jax.nn.softmax(xr @ w2r + b2, axis=1)
    return out, cls


if __name__ == "__main__":
    # Module hyperparameters (small, consistent with the forward pass).
    batch = 8
    in_features = 32
    out_features = 64
    num_classes = 16

    key = jax.random.PRNGKey(0)
    kx, kw1, kb1, kw2, kb2 = jax.random.split(key, 5)

    x = jax.random.normal(kx, (batch, in_features), dtype=jnp.float32)

    # Deterministic parameter init; weights stored as (in, out), i.e.
    # transposed relative to PyTorch's (out, in) nn.Linear convention.
    w1 = jax.random.normal(kw1, (in_features, out_features), dtype=jnp.float32) * 0.1
    b1 = jax.random.normal(kb1, (1, out_features), dtype=jnp.float32) * 0.1
    w2 = jax.random.normal(kw2, (in_features, num_classes), dtype=jnp.float32) * 0.1
    b2 = jax.random.normal(kb2, (1, num_classes), dtype=jnp.float32) * 0.1

    out, cls = layer_block(x, w1, b1, w2, b2)
    out, cls = jax.block_until_ready((out, cls))

    out_ref, cls_ref = reference(x, w1, b1, w2, b2)
    assert out.shape == (batch, out_features)
    assert cls.shape == (batch, num_classes)
    assert out.dtype == jnp.bfloat16 and cls.dtype == jnp.bfloat16

    out_f = out.astype(jnp.float32)
    cls_f = cls.astype(jnp.float32)
    # Tolerances account for the bf16 output writeback (perf-review item 2).
    assert jnp.allclose(out_f, out_ref, atol=2e-2, rtol=2e-2)
    assert jnp.allclose(cls_f, cls_ref, atol=1e-2, rtol=5e-2)
    # Softmax rows (over the real, unpadded classes) must sum to ~1.
    assert jnp.allclose(jnp.sum(cls_f, axis=1), 1.0, atol=3e-2)

    print("KERNEL_OK")
</pallas_src>

<mosaic_0001>
module attributes {stable_mosaic.version = 11 : i64} {
  func.func @layer_block_kernel(%arg0: i32, %arg1: memref<8x32xf32, #tpu.memory_space<vmem>>, %arg2: memref<32x256xbf16, #tpu.memory_space<vmem>>, %arg3: memref<1x256xf32, #tpu.memory_space<vmem>>, %arg4: memref<8x64xbf16, #tpu.memory_space<vmem>>, %arg5: memref<8x16xbf16, #tpu.memory_space<vmem>>) attributes {dimension_semantics = [#tpu.dimension_semantics<parallel>], iteration_bounds = array<i64: 1>, scalar_prefetch = 0 : i64, scratch_operands = 0 : i64, tpu.core_type = #tpu.core_type<tc>, window_params = [{transform_indices = @transform_0, window_bounds = array<i64: 8, 32>}, {pipeline_mode = #tpu.pipeline_mode<synchronous>, transform_indices = @transform_1, window_bounds = array<i64: 32, 256>}, {pipeline_mode = #tpu.pipeline_mode<synchronous>, transform_indices = @transform_2, window_bounds = array<i64: 1, 256>}, {transform_indices = @transform_3, window_bounds = array<i64: 8, 64>}, {transform_indices = @transform_4, window_bounds = array<i64: 8, 16>}]} {
    %c0 = arith.constant 0 : index
    %c0_0 = arith.constant 0 : index
    %0 = vector.load %arg1[%c0, %c0_0] : memref<8x32xf32, #tpu.memory_space<vmem>>, vector<8x32xf32>
    %1 = arith.truncf %0 : vector<8x32xf32> to vector<8x32xbf16>
    %c0_1 = arith.constant 0 : index
    %c0_2 = arith.constant 0 : index
    %2 = vector.load %arg2[%c0_1, %c0_2] : memref<32x256xbf16, #tpu.memory_space<vmem>>, vector<32x256xbf16>
    %cst = arith.constant dense<0.000000e+00> : vector<8x256xf32>
    %3 = tpu.matmul %1, %2, %cst {dimension_numbers = #tpu.dot_dimension_numbers<[1], [0], [0], [1], [0, 0, 1, 1], [], []>} : vector<8x32xbf16>, vector<32x256xbf16>, vector<8x256xf32> -> vector<8x256xf32>
    %c0_3 = arith.constant 0 : index
    %c0_4 = arith.constant 0 : index
    %4 = vector.load %arg3[%c0_3, %c0_4] : memref<1x256xf32, #tpu.memory_space<vmem>>, vector<1x256xf32>
    %5 = vector.broadcast %4 : vector<1x256xf32> to vector<8x256xf32>
    %6 = arith.addf %3, %5 : vector<8x256xf32>
    %7 = vector.extract_strided_slice %6 {offsets = [0, 0], sizes = [8, 64], strides = [1, 1]} : vector<8x256xf32> to vector<8x64xf32>
    %cst_5 = arith.constant 0.000000e+00 : f32
    %8 = vector.broadcast %cst_5 : f32 to vector<8x64xf32>
    %9 = arith.maximumf %7, %8 : vector<8x64xf32>
    %10 = arith.truncf %9 : vector<8x64xf32> to vector<8x64xbf16>
    %c0_6 = arith.constant 0 : index
    %c0_7 = arith.constant 0 : index
    %11 = vector.load %arg4[%c0_6, %c0_7] : memref<8x64xbf16, #tpu.memory_space<vmem>>, vector<8x64xbf16>
    tpu.vector_store %arg4[%c0_6, %c0_7], %10 {strides = array<i32>} : memref<8x64xbf16, #tpu.memory_space<vmem>>, vector<8x64xbf16>,
    %12 = vector.extract_strided_slice %6 {offsets = [0, 128], sizes = [8, 16], strides = [1, 1]} : vector<8x256xf32> to vector<8x16xf32>
    %cst_8 = arith.constant dense<0xFF800000> : vector<8xf32>
    %13 = vector.multi_reduction <maximumf>, %12, %cst_8 [1] : vector<8x16xf32> to vector<8xf32>
    %14 = vector.shape_cast %13 : vector<8xf32> to vector<8x1xf32>
    %15 = vector.broadcast %14 : vector<8x1xf32> to vector<8x16xf32>
    %16 = arith.subf %12, %15 : vector<8x16xf32>
    %17 = math.exp %16 : vector<8x16xf32>
    %cst_9 = arith.constant dense<0.000000e+00> : vector<8xf32>
    %18 = vector.multi_reduction <add>, %17, %cst_9 [1] : vector<8x16xf32> to vector<8xf32>
    %19 = vector.shape_cast %18 : vector<8xf32> to vector<8x1xf32>
    %20 = tpu.reciprocal %19 : vector<8x1xf32> -> vector<8x1xf32>
    %21 = vector.broadcast %20 : vector<8x1xf32> to vector<8x16xf32>
    %22 = arith.mulf %17, %21 : vector<8x16xf32>
    %23 = arith.truncf %22 : vector<8x16xf32> to vector<8x16xbf16>
    %c0_10 = arith.constant 0 : index
    %c0_11 = arith.constant 0 : index
    %24 = vector.load %arg5[%c0_10, %c0_11] : memref<8x16xbf16, #tpu.memory_space<vmem>>, vector<8x16xbf16>
    tpu.vector_store %arg5[%c0_10, %c0_11], %23 {strides = array<i32>} : memref<8x16xbf16, #tpu.memory_space<vmem>>, vector<8x16xbf16>,
    return
  }
  func.func @transform_0(%arg0: i32) -> (i32, i32) {
    %c0_i32 = arith.constant 0 : i32
    %c0_i32_0 = arith.constant 0 : i32
    return %arg0, %c0_i32 : i32, i32
  }
  func.func @transform_1(%arg0: i32) -> (i32, i32) {
    %c0_i32 = arith.constant 0 : i32
    %c0_i32_0 = arith.constant 0 : i32
    %c0_i32_1 = arith.constant 0 : i32
    return %c0_i32, %c0_i32_0 : i32, i32
  }
  func.func @transform_2(%arg0: i32) -> (i32, i32) {
    %c0_i32 = arith.constant 0 : i32
    %c0_i32_0 = arith.constant 0 : i32
    %c0_i32_1 = arith.constant 0 : i32
    return %c0_i32, %c0_i32_0 : i32, i32
  }
  func.func @transform_3(%arg0: i32) -> (i32, i32) {
    %c0_i32 = arith.constant 0 : i32
    %c0_i32_0 = arith.constant 0 : i32
    return %arg0, %c0_i32 : i32, i32
  }
  func.func @transform_4(%arg0: i32) -> (i32, i32) {
    %c0_i32 = arith.constant 0 : i32
    %c0_i32_0 = arith.constant 0 : i32
    return %arg0, %c0_i32 : i32, i32
  }
}

module attributes {stable_mosaic.version = 11 : i64} {
  func.func @layer_block_kernel(%arg0: i32, %arg1: memref<8x32xf32, #tpu.memory_space<vmem>>, %arg2: memref<32x256xbf16, #tpu.memory_space<vmem>>, %arg3: memref<1x256xf32, #tpu.memory_space<vmem>>, %arg4: memref<8x64xbf16, #tpu.memory_space<vmem>>, %arg5: memref<8x16xbf16, #tpu.memory_space<vmem>>) attributes {dimension_semantics = [#tpu.dimension_semantics<parallel>], iteration_bounds = array<i64: 1>, scalar_prefetch = 0 : i64, scratch_operands = 0 : i64, tpu.core_type = #tpu.core_type<tc>, window_params = [{transform_indices = @transform_0, window_bounds = array<i64: 8, 32>}, {pipeline_mode = #tpu.pipeline_mode<synchronous>, transform_indices = @transform_1, window_bounds = array<i64: 32, 256>}, {pipeline_mode = #tpu.pipeline_mode<synchronous>, transform_indices = @transform_2, window_bounds = array<i64: 1, 256>}, {transform_indices = @transform_3, window_bounds = array<i64: 8, 64>}, {transform_indices = @transform_4, window_bounds = array<i64: 8, 16>}]} {
    %c0 = arith.constant 0 : index
    %c0_0 = arith.constant 0 : index
    %0 = vector.load %arg1[%c0, %c0_0] : memref<8x32xf32, #tpu.memory_space<vmem>>, vector<8x32xf32>
    %1 = arith.truncf %0 : vector<8x32xf32> to vector<8x32xbf16>
    %c0_1 = arith.constant 0 : index
    %c0_2 = arith.constant 0 : index
    %2 = vector.load %arg2[%c0_1, %c0_2] : memref<32x256xbf16, #tpu.memory_space<vmem>>, vector<32x256xbf16>
    %cst = arith.constant dense<0.000000e+00> : vector<8x256xf32>
    %3 = tpu.matmul %1, %2, %cst {dimension_numbers = #tpu.dot_dimension_numbers<[1], [0], [0], [1], [0, 0, 1, 1], [], []>} : vector<8x32xbf16>, vector<32x256xbf16>, vector<8x256xf32> -> vector<8x256xf32>
    %c0_3 = arith.constant 0 : index
    %c0_4 = arith.constant 0 : index
    %4 = vector.load %arg3[%c0_3, %c0_4] : memref<1x256xf32, #tpu.memory_space<vmem>>, vector<1x256xf32>
    %5 = vector.broadcast %4 : vector<1x256xf32> to vector<8x256xf32>
    %6 = arith.addf %3, %5 : vector<8x256xf32>
    %7 = vector.extract_strided_slice %6 {offsets = [0, 0], sizes = [8, 64], strides = [1, 1]} : vector<8x256xf32> to vector<8x64xf32>
    %cst_5 = arith.constant 0.000000e+00 : f32
    %8 = vector.broadcast %cst_5 : f32 to vector<8x64xf32>
    %9 = arith.maximumf %7, %8 : vector<8x64xf32>
    %10 = arith.truncf %9 : vector<8x64xf32> to vector<8x64xbf16>
    %c0_6 = arith.constant 0 : index
    %c0_7 = arith.constant 0 : index
    %11 = vector.load %arg4[%c0_6, %c0_7] : memref<8x64xbf16, #tpu.memory_space<vmem>>, vector<8x64xbf16>
    tpu.vector_store %arg4[%c0_6, %c0_7], %10 {strides = array<i32>} : memref<8x64xbf16, #tpu.memory_space<vmem>>, vector<8x64xbf16>,
    %12 = vector.extract_strided_slice %6 {offsets = [0, 128], sizes = [8, 16], strides = [1, 1]} : vector<8x256xf32> to vector<8x16xf32>
    %cst_8 = arith.constant dense<0xFF800000> : vector<8xf32>
    %13 = vector.multi_reduction <maximumf>, %12, %cst_8 [1] : vector<8x16xf32> to vector<8xf32>
    %14 = vector.shape_cast %13 : vector<8xf32> to vector<8x1xf32>
    %15 = vector.broadcast %14 : vector<8x1xf32> to vector<8x16xf32>
    %16 = arith.subf %12, %15 : vector<8x16xf32>
    %17 = math.exp %16 : vector<8x16xf32>
    %cst_9 = arith.constant dense<0.000000e+00> : vector<8xf32>
    %18 = vector.multi_reduction <add>, %17, %cst_9 [1] : vector<8x16xf32> to vector<8xf32>
    %19 = vector.shape_cast %18 : vector<8xf32> to vector<8x1xf32>
    %20 = tpu.reciprocal %19 : vector<8x1xf32> -> vector<8x1xf32>
    %21 = vector.broadcast %20 : vector<8x1xf32> to vector<8x16xf32>
    %22 = arith.mulf %17, %21 : vector<8x16xf32>
    %23 = arith.truncf %22 : vector<8x16xf32> to vector<8x16xbf16>
    %c0_10 = arith.constant 0 : index
    %c0_11 = arith.constant 0 : index
    %24 = vector.load %arg5[%c0_10, %c0_11] : memref<8x16xbf16, #tpu.memory_space<vmem>>, vector<8x16xbf16>
    tpu.vector_store %arg5[%c0_10, %c0_11], %23 {strides = array<i32>} : memref<8x16xbf16, #tpu.memory_space<vmem>>, vector<8x16xbf16>,
    return
  }
  func.func @transform_0(%arg0: i32) -> (i32, i32) {
    %c0_i32 = arith.constant 0 : i32
    %c0_i32_0 = arith.constant 0 : i32
    return %arg0, %c0_i32 : i32, i32
  }
  func.func @transform_1(%arg0: i32) -> (i32, i32) {
    %c0_i32 = arith.constant 0 : i32
    %c0_i32_0 = arith.constant 0 : i32
    %c0_i32_1 = arith.constant 0 : i32
    return %c0_i32, %c0_i32_0 : i32, i32
  }
  func.func @transform_2(%arg0: i32) -> (i32, i32) {
    %c0_i32 = arith.constant 0 : i32
    %c0_i32_0 = arith.constant 0 : i32
    %c0_i32_1 = arith.constant 0 : i32
    return %c0_i32, %c0_i32_0 : i32, i32
  }
  func.func @transform_3(%arg0: i32) -> (i32, i32) {
    %c0_i32 = arith.constant 0 : i32
    %c0_i32_0 = arith.constant 0 : i32
    return %arg0, %c0_i32 : i32, i32
  }
  func.func @transform_4(%arg0: i32) -> (i32, i32) {
    %c0_i32 = arith.constant 0 : i32
    %c0_i32_0 = arith.constant 0 : i32
    return %arg0, %c0_i32 : i32, i32
  }
}

</mosaic_0001>

<bundles_post_ra>
// kernel: tpu_custom_call.1
= control target key start
LH: loop header
LB: loop body
LE: loop exit
PB: predicated region body
PF: predicated region fallthrough
CT: control target
= control target key end

     0   :  { %10 = vsyncpa [#allocation3], 0  ;;  %s402_s0 = inlined_call_operand.hbm [shape: f32[8,32], index: 0, kind: input, shape index: {}]   ;;  %s403_s1 = inlined_call_operand.hbm [shape: bf16[32,256], index: 1, kind: input, shape index: {}]   ;;  %s404_s2 = inlined_call_operand.hbm [shape: f32[1,256], index: 2, kind: input, shape index: {}]   ;;  %s405_s3 = inlined_call_operand.hbm [shape: bf16[8,64], index: 3, kind: output, shape index: {0}]   ;;  %s406_s4 = inlined_call_operand.hbm [shape: bf16[8,16], index: 4, kind: output, shape index: {1}]  }
   0x1   :  { %11 = vsyncpa [#allocation6], 0 }
   0x2   :  { %12 = vsyncpa [#allocation4], 0  ;;  %s29_s17 = sshll.u32 %s403_s1, 4  ;;  %s30_s17 = int_to_ptr.hbm [resolvable:$true] %s29_s17 }
   0x3   :  { %13 = vsyncpa [#allocation10], 0  ;;  %s351_s18 = smov [#allocation5]   ;;  %s19_s22 = sshll.u32 %s402_s0, 4  ;;  %s20_s22 = int_to_ptr.hbm [resolvable:$true] %s19_s22 }
   0x4   :  { %s31_s19 = sshll.u32 %s351_s18, 4  ;;  %s352_s23 = smov 128   ;;  %s32_s19 = int_to_ptr.vmem [resolvable:$true] %s31_s19 }
   0x5   :  { %s353_s24 = smov 8   ;;  %s354_s25 = smov [#allocation2]  }
   0x6   :  { %37 = dma.hbm_to_vmem [thread:$0]  %s30_s17, 512, %s32_s19, [#allocation6], %s352_s23, %s352_s23, %s353_s24  }
   0x7   :  { %s21_s26 = sshll.u32 %s354_s25, 4  ;;  %s43_s29 = sshll.u32 %s404_s2, 4  ;;  %s22_s26 = int_to_ptr.vmem [resolvable:$true] %s21_s26  ;;  %s44_s29 = int_to_ptr.hbm [resolvable:$true] %s43_s29 }
   0x8   :  { %24 = dma.hbm_to_vmem [thread:$0]  %s20_s22, 128, %s22_s26, [#allocation3]  }
   0x9   :  { %s355_s1 = smov [#allocation7]  }
   0xa   :  { %s45_s30 = sshll.u32 %s355_s1, 4  ;;  %s46_s30 = int_to_ptr.vmem [resolvable:$true] %s45_s30 }
   0xb   :  { %48 = dma.hbm_to_vmem [thread:$0]  %s44_s29, 32, %s46_s30, [#allocation6]  }
   0xc   :  { %343 = dma.done.wait [#allocation3], 128  }
   0xd   :  { %344 = vsyncadd [#allocation3], 4294967168 }
   0xe   :  { %345 = dma.done.wait [#allocation6], 544  }
   0xf   :  { %346 = vsyncadd [#allocation6], 4294966752  ;;  %v210_v0 = vld [vmem:[#allocation5 + $0x14] sm:$0xf]  ;;  %v202_v1 = vld [vmem:[#allocation5 + $0x18] sm:$0xf0] }
  0x10   :  { %v208_v2 = vld [vmem:[#allocation5 + $0x4] sm:$0xf]  ;;  %v205_v3 = vor.u32 %v210_v0, %v202_v1  ;;  %v194_v4 = vld [vmem:[#allocation5 + $0x8] sm:$0xf0]  ;;  %v62_v6 = vld [vmem:[#allocation2] sm:$0xff]  ;;  %vm94_vm0 = vcmask 261120  }
  0x11   :  { %v197_v5 = vor.u32 %v208_v2, %v194_v4  ;;  %v63_v7 = vpack.c.bf16 %v62_v6, %v62_v6  ;;  %v68_v8 = vld [vmem:[#allocation7] sm:$0x3]  ;;  %vm128_vm1 = vcmask 130048   ;;  %v200_v14 = vld [vmem:[#allocation5 + $0x10] sm:$0xf]  ;;  %s356_s0 = smov [#allocation8]  }
  0x12   :  { %117 = vmatpush.bf16.msra.mxu1 %v205_v3  ;;  %v71_v9 = vperm.slane %v68_v8, 1  ;;  %v211_v15 = vld [vmem:[#allocation5 + $0x14] sm:$0xf0]  ;;  %v192_v17 = vld [vmem:[#allocation5] sm:$0xf]  ;;  %v70_v26 = vperm.slane %v68_v8, 0 }
  0x13   :  { %v201_v16 = vor.u32 %v211_v15, %v200_v14  ;;  %v209_v18 = vld [vmem:[#allocation5 + $0x4] sm:$0xf0]  ;;  %s161_s2 = sshll.u32 %s356_s0, 4  ;;  %s163_s7 = sshll.u32 %s405_s3, 4  ;;  %vm126_vm2 = vcmask 519168   ;;  %vm154_vm7 = vcmask 125952   ;;  %s162_s2 = int_to_ptr.vmem [resolvable:$true] %s161_s2  ;;  %s164_s7 = int_to_ptr.hbm [resolvable:$true] %s163_s7 }
  0x14   :  { %v193_v19 = vor.u32 %v209_v18, %v192_v17  ;;  %s357_s3 = smov [#allocation9]   ;;  %s174_s11 = sshll.u32 %s406_s4, 4  ;;  %s175_s11 = int_to_ptr.hbm [resolvable:$true] %s174_s11 }
  0x15   :  { %104 = vmatpush.bf16.msra.mxu0 %v201_v16  ;;  %s172_s8 = sshll.u32 %s357_s3, 4  ;;  %s173_s8 = int_to_ptr.vmem [resolvable:$true] %s172_s8 }
  0x16   :  { %118 = vmatpush.bf16.msra.mxu1 %v197_v5 }
  0x19   :  { %207 = vmatmul.msk.bf16.vlgmr.msra.gmra.mxu1 %vm94_vm0, %v63_v7  ;;  %105 = vmatpush.bf16.msra.mxu0 %v193_v19 }
  0x1c   :  { %206 = vmatmul.msk.bf16.vlgmr.msra.gmra.mxu0 %vm94_vm0, %v63_v7 }
  0x96   :  { %v120_v10 = vpop.f32.mrf.mxu1 }
  0x97   :  { %v121_v11 = vadd.f32 %v120_v10, %v71_v9 }
  0x99   :  { %v129_v12 = vsel %vm128_vm1, %v121_v11, -inf  ;;  %v107_v25 = vpop.f32.mrf.mxu0 }
  0x9a   :  { %130 = vmax.xlane.f32.xlu0 %v129_v12  ;;  %v108_v28 = vadd.f32 %v107_v25, %v70_v26 }
  0x9c   :  { %v124_v29 = vmax.f32 %v108_v28, 0.0 }
  0x9e   :  { %v122_v13 = vpop.f32.mrf.mxu1  ;;  %v125_v30 = vpack.c.bf16 %v124_v29, %v124_v29 }
  0xa0   :  { %127 = vst.msk [vmem:[#allocation8] sm:$0xf] %vm126_vm2, %v125_v30 }
  0xa1   :  { %v109_v27 = vpop.f32.mrf.mxu0  ;;  %166 = dma.vmem_to_hbm [thread:$0]  %s162_s2, 64, %s164_s7, [#allocation4]  }
 0x10d   :  { %v131_v20 = vpop.xlane.xlu0 %130 }
 0x10e   :  { %v132_v21 = vsub.f32 %v121_v11, %v131_v20 }
 0x110   :  { %v133_v22 = vmul.f32 1.442695, %v132_v21 }
 0x112   :  { %219 = vpow2.f32 %v133_v22 }
 0x118   :  { %v220_v23 = vpop.eup %219 }
 0x119   :  { %v135_v24 = vsel %vm128_vm1, %v220_v23, 0.0 }
 0x11a   :  { %136 = vadd.xlane.f32.xlu0 %v135_v24 }
 0x18d   :  { %v137_v31 = vpop.xlane.xlu0 %136 }
 0x18e   :  { %221 = vrcp.f32 %v137_v31  ;;  %v149_v35 = vand.u32 2147483648, %v137_v31  ;;  %v147_v37 = vand.u32 2147483647, %v137_v31  ;;  %vm143_vm4 = vweird.f32 %v137_v31 }
 0x190   :  { %v150_v39 = vor.u32 1.1754944e-38, %v149_v35  ;;  %vm148_vm6 = vcmp.eq.f32.partialorder %v147_v37, 8.507059e+37 }
 0x194   :  { %v222_v32 = vpop.eup %221 }
 0x195   :  { %v139_v33 = vmul.f32 %v222_v32, %v137_v31  ;;  %vm144_vm3 = vweird.f32 %v222_v32 }
 0x196   :  { %vm145_vm5 = vmor %vm143_vm4, %vm144_vm3 }
 0x197   :  { %v140_v34 = vsub.f32 1.0, %v139_v33 }
 0x199   :  { %v141_v36 = vmul.f32 %v222_v32, %v140_v34 }
 0x19b   :  { %v142_v38 = vadd.f32 %v222_v32, %v141_v36 }
 0x19d   :  { %v146_v40 = vsel %vm145_vm5, %v222_v32, %v142_v38 }
 0x19e   :  { %v151_v41 = vsel %vm148_vm6, %v150_v39, %v146_v40 }
 0x19f   :  { %v152_v42 = vmul.f32 %v220_v23, %v151_v41 }
 0x1a1   :  { %v153_v43 = vpack.c.bf16 %v152_v42, %v152_v42 }
 0x1a3   :  { %155 = vst.msk [vmem:[#allocation9] sm:$0xf] %vm154_vm7, %v153_v43 }
 0x1a4   :  { %177 = dma.vmem_to_hbm [thread:$0]  %s173_s8, 64, %s175_s11, [#allocation10]  }
 0x1a5   :  { %347 = dma.done.wait [#allocation4], 64  }
 0x1a6   :  { %348 = vsyncadd [#allocation4], 4294967232 }
 0x1a7   :  { %349 = dma.done.wait [#allocation10], 64  }
 0x1a8   :  { %350 = vsyncadd [#allocation10], 4294967232 }
 0x1a9   :  { %186 = vsyncpa [#allocation3], 1 }
 0x1aa   :  { %187 = vsyncpa [#allocation6], 1 }
 0x1ab   :  { %188 = vsyncpa [#allocation4], 1 }
 0x1ac   :  { %189 = vsyncpa [#allocation10], 1 }

// kernel: tpu_custom_call.1
= control target key start
LH: loop header
LB: loop body
LE: loop exit
PB: predicated region body
PF: predicated region fallthrough
CT: control target
= control target key end

     0   :  { %10 = vsyncpa [#allocation3], 0  ;;  %s402_s0 = inlined_call_operand.hbm [shape: f32[8,32], index: 0, kind: input, shape index: {}]   ;;  %s403_s1 = inlined_call_operand.hbm [shape: bf16[32,256], index: 1, kind: input, shape index: {}]   ;;  %s404_s2 = inlined_call_operand.hbm [shape: f32[1,256], index: 2, kind: input, shape index: {}]   ;;  %s405_s3 = inlined_call_operand.hbm [shape: bf16[8,64], index: 3, kind: output, shape index: {0}]   ;;  %s406_s4 = inlined_call_operand.hbm [shape: bf16[8,16], index: 4, kind: output, shape index: {1}]  }
   0x1   :  { %11 = vsyncpa [#allocation6], 0 }
   0x2   :  { %12 = vsyncpa [#allocation4], 0  ;;  %s29_s17 = sshll.u32 %s403_s1, 4  ;;  %s30_s17 = int_to_ptr.hbm [resolvable:$true] %s29_s17 }
   0x3   :  { %13 = vsyncpa [#allocation10], 0  ;;  %s351_s18 = smov [#allocation5]   ;;  %s19_s22 = sshll.u32 %s402_s0, 4  ;;  %s20_s22 = int_to_ptr.hbm [resolvable:$true] %s19_s22 }
   0x4   :  { %s31_s19 = sshll.u32 %s351_s18, 4  ;;  %s352_s23 = smov 128   ;;  %s32_s19 = int_to_ptr.vmem [resolvable:$true] %s31_s19 }
   0x5   :  { %s353_s24 = smov 8   ;;  %s354_s25 = smov [#allocation2]  }
   0x6   :  { %37 = dma.hbm_to_vmem [thread:$0]  %s30_s17, 512, %s32_s19, [#allocation6], %s352_s23, %s352_s23, %s353_s24  }
   0x7   :  { %s21_s26 = sshll.u32 %s354_s25, 4  ;;  %s43_s29 = sshll.u32 %s404_s2, 4  ;;  %s22_s26 = int_to_ptr.vmem [resolvable:$true] %s21_s26  ;;  %s44_s29 = int_to_ptr.hbm [resolvable:$true] %s43_s29 }
   0x8   :  { %24 = dma.hbm_to_vmem [thread:$0]  %s20_s22, 128, %s22_s26, [#allocation3]  }
   0x9   :  { %s355_s1 = smov [#allocation7]  }
   0xa   :  { %s45_s30 = sshll.u32 %s355_s1, 4  ;;  %s46_s30 = int_to_ptr.vmem [resolvable:$true] %s45_s30 }
   0xb   :  { %48 = dma.hbm_to_vmem [thread:$0]  %s44_s29, 32, %s46_s30, [#allocation6]  }
   0xc   :  { %343 = dma.done.wait [#allocation3], 128  }
   0xd   :  { %344 = vsyncadd [#allocation3], 4294967168 }
   0xe   :  { %345 = dma.done.wait [#allocation6], 544  }
   0xf   :  { %346 = vsyncadd [#allocation6], 4294966752  ;;  %v210_v0 = vld [vmem:[#allocation5 + $0x14] sm:$0xf]  ;;  %v202_v1 = vld [vmem:[#allocation5 + $0x18] sm:$0xf0] }
  0x10   :  { %v208_v2 = vld [vmem:[#allocation5 + $0x4] sm:$0xf]  ;;  %v205_v3 = vor.u32 %v210_v0, %v202_v1  ;;  %v194_v4 = vld [vmem:[#allocation5 + $0x8] sm:$0xf0]  ;;  %v62_v6 = vld [vmem:[#allocation2] sm:$0xff]  ;;  %vm94_vm0 = vcmask 261120  }
  0x11   :  { %v197_v5 = vor.u32 %v208_v2, %v194_v4  ;;  %v63_v7 = vpack.c.bf16 %v62_v6, %v62_v6  ;;  %v68_v8 = vld [vmem:[#allocation7] sm:$0x3]  ;;  %vm128_vm1 = vcmask 130048   ;;  %v200_v14 = vld [vmem:[#allocation5 + $0x10] sm:$0xf]  ;;  %s356_s0 = smov [#allocation8]  }
  0x12   :  { %117 = vmatpush.bf16.msra.mxu1 %v205_v3  ;;  %v71_v9 = vperm.slane %v68_v8, 1  ;;  %v211_v15 = vld [vmem:[#allocation5 + $0x14] sm:$0xf0]  ;;  %v192_v17 = vld [vmem:[#allocation5] sm:$0xf]  ;;  %v70_v26 = vperm.slane %v68_v8, 0 }
  0x13   :  { %v201_v16 = vor.u32 %v211_v15, %v200_v14  ;;  %v209_v18 = vld [vmem:[#allocation5 + $0x4] sm:$0xf0]  ;;  %s161_s2 = sshll.u32 %s356_s0, 4  ;;  %s163_s7 = sshll.u32 %s405_s3, 4  ;;  %vm126_vm2 = vcmask 519168   ;;  %vm154_vm7 = vcmask 125952   ;;  %s162_s2 = int_to_ptr.vmem [resolvable:$true] %s161_s2  ;;  %s164_s7 = int_to_ptr.hbm [resolvable:$true] %s163_s7 }
  0x14   :  { %v193_v19 = vor.u32 %v209_v18, %v192_v17  ;;  %s357_s3 = smov [#allocation9]   ;;  %s174_s11 = sshll.u32 %s406_s4, 4  ;;  %s175_s11 = int_to_ptr.hbm [resolvable:$true] %s174_s11 }
  0x15   :  { %104 = vmatpush.bf16.msra.mxu0 %v201_v16  ;;  %s172_s8 = sshll.u32 %s357_s3, 4  ;;  %s173_s8 = int_to_ptr.vmem [resolvable:$true] %s172_s8 }
  0x16   :  { %118 = vmatpush.bf16.msra.mxu1 %v197_v5 }
  0x19   :  { %207 = vmatmul.msk.bf16.vlgmr.msra.gmra.mxu1 %vm94_vm0, %v63_v7  ;;  %105 = vmatpush.bf16.msra.mxu0 %v193_v19 }
  0x1c   :  { %206 = vmatmul.msk.bf16.vlgmr.msra.gmra.mxu0 %vm94_vm0, %v63_v7 }
  0x96   :  { %v120_v10 = vpop.f32.mrf.mxu1 }
  0x97   :  { %v121_v11 = vadd.f32 %v120_v10, %v71_v9 }
  0x99   :  { %v129_v12 = vsel %vm128_vm1, %v121_v11, -inf  ;;  %v107_v25 = vpop.f32.mrf.mxu0 }
  0x9a   :  { %130 = vmax.xlane.f32.xlu0 %v129_v12  ;;  %v108_v28 = vadd.f32 %v107_v25, %v70_v26 }
  0x9c   :  { %v124_v29 = vmax.f32 %v108_v28, 0.0 }
  0x9e   :  { %v122_v13 = vpop.f32.mrf.mxu1  ;;  %v125_v30 = vpack.c.bf16 %v124_v29, %v124_v29 }
  0xa0   :  { %127 = vst.msk [vmem:[#allocation8] sm:$0xf] %vm126_vm2, %v125_v30 }
  0xa1   :  { %v109_v27 = vpop.f32.mrf.mxu0  ;;  %166 = dma.vmem_to_hbm [thread:$0]  %s162_s2, 64, %s164_s7, [#allocation4]  }
 0x10d   :  { %v131_v20 = vpop.xlane.xlu0 %130 }
 0x10e   :  { %v132_v21 = vsub.f32 %v121_v11, %v131_v20 }
 0x110   :  { %v133_v22 = vmul.f32 1.442695, %v132_v21 }
 0x112   :  { %219 = vpow2.f32 %v133_v22 }
 0x118   :  { %v220_v23 = vpop.eup %219 }
 0x119   :  { %v135_v24 = vsel %vm128_vm1, %v220_v23, 0.0 }
 0x11a   :  { %136 = vadd.xlane.f32.xlu0 %v135_v24 }
 0x18d   :  { %v137_v31 = vpop.xlane.xlu0 %136 }
 0x18e   :  { %221 = vrcp.f32 %v137_v31  ;;  %v149_v35 = vand.u32 2147483648, %v137_v31  ;;  %v147_v37 = vand.u32 2147483647, %v137_v31  ;;  %vm143_vm4 = vweird.f32 %v137_v31 }
 0x190   :  { %v150_v39 = vor.u32 1.1754944e-38, %v149_v35  ;;  %vm148_vm6 = vcmp.eq.f32.partialorder %v147_v37, 8.507059e+37 }
 0x194   :  { %v222_v32 = vpop.eup %221 }
 0x195   :  { %v139_v33 = vmul.f32 %v222_v32, %v137_v31  ;;  %vm144_vm3 = vweird.f32 %v222_v32 }
 0x196   :  { %vm145_vm5 = vmor %vm143_vm4, %vm144_vm3 }
 0x197   :  { %v140_v34 = vsub.f32 1.0, %v139_v33 }
 0x199   :  { %v141_v36 = vmul.f32 %v222_v32, %v140_v34 }
 0x19b   :  { %v142_v38 = vadd.f32 %v222_v32, %v141_v36 }
 0x19d   :  { %v146_v40 = vsel %vm145_vm5, %v222_v32, %v142_v38 }
 0x19e   :  { %v151_v41 = vsel %vm148_vm6, %v150_v39, %v146_v40 }
 0x19f   :  { %v152_v42 = vmul.f32 %v220_v23, %v151_v41 }
 0x1a1   :  { %v153_v43 = vpack.c.bf16 %v152_v42, %v152_v42 }
 0x1a3   :  { %155 = vst.msk [vmem:[#allocation9] sm:$0xf] %vm154_vm7, %v153_v43 }
 0x1a4   :  { %177 = dma.vmem_to_hbm [thread:$0]  %s173_s8, 64, %s175_s11, [#allocation10]  }
 0x1a5   :  { %347 = dma.done.wait [#allocation4], 64  }
 0x1a6   :  { %348 = vsyncadd [#allocation4], 4294967232 }
 0x1a7   :  { %349 = dma.done.wait [#allocation10], 64  }
 0x1a8   :  { %350 = vsyncadd [#allocation10], 4294967232 }
 0x1a9   :  { %186 = vsyncpa [#allocation3], 1 }
 0x1aa   :  { %187 = vsyncpa [#allocation6], 1 }
 0x1ab   :  { %188 = vsyncpa [#allocation4], 1 }
 0x1ac   :  { %189 = vsyncpa [#allocation10], 1 }

</bundles_post_ra>
